<compile_context>
chip_gen: v7x
topology: tpu7x:2x2x1
jax: 0.10.0
libtpu: 0.0.40
codegen_flags: <defaults>
</compile_context>

<pallas_src>
import functools

import numpy as np
import jax
import jax.numpy as jnp
from jax.experimental import pallas as pl
from jax.experimental.pallas import tpu as pltpu


def _interp_matrix_np(out_size: int, in_size: int) -> np.ndarray:
    """(out_size, in_size) row-stochastic bilinear-resize matrix, align_corners=True."""
    if out_size == 1:
        src = np.zeros((1,), np.float64)
    else:
        src = np.arange(out_size, dtype=np.float64) * (in_size - 1) / (out_size - 1)
    lo = np.clip(np.floor(src).astype(np.int64), 0, in_size - 1)
    hi = np.minimum(lo + 1, in_size - 1)
    w_hi = src - lo
    w_lo = 1.0 - w_hi
    m = np.zeros((out_size, in_size), np.float64)
    rows = np.arange(out_size)
    np.add.at(m, (rows, lo), w_lo)
    np.add.at(m, (rows, hi), w_hi)
    return m


@functools.lru_cache(maxsize=None)
def _resize_matrix_bf16(hi: int, wi: int, ho: int, wo: int):
    """Cached fused resize matrix Kt = kron(Wy, Wx).T, shape (hi*wi, ho*wo), bf16."""
    wy = _interp_matrix_np(ho, hi)
    wx = _interp_matrix_np(wo, wi)
    return jnp.asarray(np.kron(wy, wx).T, dtype=jnp.bfloat16)


def _conv1x1_rows(x, w_ref, n, cin, cout):
    """1x1 conv as f32 VPU broadcast-FMA (weights are SMEM scalars).

    x: (n*cin, hw) f32 value.  Returns (n*cout, hw) f32, row order n-major / cout-minor.
    """
    rows = []
    for b in range(n):
        base = b * cin
        for o in range(cout):
            acc = w_ref[o, 0] * x[base:base + 1, :]
            for c in range(1, cin):
                acc = acc + w_ref[o, c] * x[base + c:base + c + 1, :]
            rows.append(acc)
    return jnp.concatenate(rows, axis=0)


def _conv_resize_kernel(x_ref, w_ref, kt_ref, b_ref, o_ref):
    # x_ref : (N*Cin, Hi*Wi)       f32   VMEM
    # w_ref : (Cout, Cin)          f32   SMEM (scalar reads)
    # kt_ref: (Hi*Wi, lane_tile)   bf16  VMEM
    # b_ref : (N*Cout, 1)          f32   VMEM
    # o_ref : (N*Cout, lane_tile)  f32   VMEM (sublane multiple of 8, lane-dense)
    cout, cin = w_ref.shape
    n = x_ref.shape[0] // cin
    conv = _conv1x1_rows(x_ref[...], w_ref, n, cin, cout)        # (N*Cout, Hi*Wi) f32
    out = jnp.dot(conv.astype(jnp.bfloat16), kt_ref[...],
                  preferred_element_type=jnp.float32)            # (N*Cout, tile) f32
    o_ref[...] = (out + b_ref[...]).astype(o_ref.dtype)


def _conv_only_kernel(x_ref, w_ref, b_ref, o_ref):
    # Skip-resize branch (spatial size already equals target_size).
    cout, cin = w_ref.shape
    n = x_ref.shape[0] // cin
    conv = _conv1x1_rows(x_ref[...], w_ref, n, cin, cout)
    o_ref[...] = (conv + b_ref[...]).astype(o_ref.dtype)


def transunet_wrapper_forward(x, conv_w, conv_b, target_size=(32, 32), *,
                              out_lane_tiles: int = 1):
    """y = conv1x1(x) + b; bilinear resize (align_corners=True) to target_size if needed."""
    N, Cin, Hi, Wi = x.shape
    Cout = conv_w.shape[0]
    Ho, Wo = target_size
    hw_in, hw_out = Hi * Wi, Ho * Wo

    # Free layout plumbing only (contiguous view); no dtype cast in the wrapper.
    x_flat = x.reshape(N * Cin, hw_in)
    w_f32 = conv_w.astype(jnp.float32)
    b_rows = jnp.tile(conv_b.reshape(Cout, 1).astype(jnp.float32), (N, 1))  # (N*Cout, 1)

    smem = pl.BlockSpec(memory_space=pltpu.MemorySpace.SMEM)
    vmem = pl.BlockSpec(memory_space=pltpu.MemorySpace.VMEM)

    if (Hi, Wi) == (Ho, Wo):
        # PyTorch wrapper skips F.interpolate entirely in this case.
        out_flat = pl.pallas_call(
            _conv_only_kernel,
            out_shape=jax.ShapeDtypeStruct((N * Cout, hw_in), x.dtype),
            in_specs=[vmem, smem, vmem],
            out_specs=vmem,
        )(x_flat, w_f32, b_rows)
        return out_flat.reshape(N, Cout, Hi, Wi)

    kt = _resize_matrix_bf16(Hi, Wi, Ho, Wo)            # (hw_in, hw_out) bf16, cached

    assert hw_out % out_lane_tiles == 0
    lane_tile = hw_out // out_lane_tiles
    assert lane_tile % 128 == 0, "output lane tile must remain a multiple of 128"

    out_flat = pl.pallas_call(
        _conv_resize_kernel,
        out_shape=jax.ShapeDtypeStruct((N * Cout, hw_out), x.dtype),
        grid_spec=pltpu.PrefetchScalarGridSpec(
            num_scalar_prefetch=0,
            grid=(out_lane_tiles,),                     # default 1 -> single step
            in_specs=[
                pl.BlockSpec((N * Cin, hw_in), lambda j: (0, 0)),
                smem,                                   # weights as SMEM scalars
                pl.BlockSpec((hw_in, lane_tile), lambda j: (0, j)),
                pl.BlockSpec((N * Cout, 1), lambda j: (0, 0)),
            ],
            out_specs=pl.BlockSpec((N * Cout, lane_tile), lambda j: (0, j)),
        ),
        compiler_params=pltpu.CompilerParams(
            dimension_semantics=("parallel",)),
    )(x_flat, w_f32, kt, b_rows)

    # Lane-dense (N*Cout, Ho*Wo) slab -> NCHW; pure layout plumbing outside the kernel.
    return out_flat.reshape(N, Cout, Ho, Wo)


if __name__ == "__main__":
    key = jax.random.PRNGKey(0)
    kx, kw, kb = jax.random.split(key, 3)

    # Small shapes consistent with the module's forward.
    N, Cin, Hi, Wi = 2, 4, 16, 16
    Cout = 4
    target_size = (32, 32)
    Ho, Wo = target_size

    x = jax.random.normal(kx, (N, Cin, Hi, Wi), dtype=jnp.float32)
    conv_w = 0.1 * jax.random.normal(kw, (Cout, Cin), dtype=jnp.float32)
    conv_b = 0.1 * jax.random.normal(kb, (Cout,), dtype=jnp.float32)

    # --- resize path (spatial size != target_size) ---
    out = transunet_wrapper_forward(x, conv_w, conv_b, target_size)
    out = jax.block_until_ready(out)
    assert out.shape == (N, Cout, Ho, Wo), out.shape

    # Reference 1: same numerics as kernel (f32 conv, bf16 operands for resize matmul).
    kt = _resize_matrix_bf16(Hi, Wi, Ho, Wo)
    conv_flat = jnp.einsum('oc,ncp->nop', conv_w,
                           x.reshape(N, Cin, Hi * Wi)).reshape(N * Cout, Hi * Wi)
    ref_bf16 = (jnp.dot(conv_flat.astype(jnp.bfloat16), kt,
                        preferred_element_type=jnp.float32)
                + jnp.tile(conv_b.reshape(Cout, 1), (N, 1))
                ).reshape(N, Cout, Ho, Wo)
    assert jnp.allclose(out, ref_bf16, atol=2e-3, rtol=2e-3)

    # Reference 2: full-f32 semantics (1x1 conv + bias, align_corners=True bilinear resize).
    wy = jnp.asarray(_interp_matrix_np(Ho, Hi), jnp.float32)
    wx = jnp.asarray(_interp_matrix_np(Wo, Wi), jnp.float32)
    conv_f32 = jnp.einsum('oc,nchw->nohw', conv_w, x) + conv_b[None, :, None, None]
    ref_f32 = jnp.einsum('pw,oh,nchw->ncop', wx, wy, conv_f32)
    assert jnp.allclose(out, ref_f32, atol=3e-2, rtol=3e-2)

    # --- skip path (spatial size == target_size): PyTorch wrapper does no interpolation ---
    out_same = transunet_wrapper_forward(x, conv_w, conv_b, (Hi, Wi))
    out_same = jax.block_until_ready(out_same)
    assert out_same.shape == (N, Cout, Hi, Wi)
    assert jnp.allclose(out_same, conv_f32, atol=1e-4, rtol=1e-4)

    print("KERNEL_OK")
</pallas_src>

<mosaic_0001>
module attributes {stable_mosaic.version = 11 : i64} {
  func.func @_conv_resize_kernel(%arg0: i32, %arg1: memref<8x256xf32, #tpu.memory_space<vmem>>, %arg2: memref<4x4xf32, #tpu.memory_space<smem>>, %arg3: memref<256x1024xbf16, #tpu.memory_space<vmem>>, %arg4: memref<8x1xf32, #tpu.memory_space<vmem>>, %arg5: memref<8x1024xf32, #tpu.memory_space<vmem>>) attributes {dimension_semantics = [#tpu.dimension_semantics<parallel>], iteration_bounds = array<i64: 1>, scalar_prefetch = 0 : i64, scratch_operands = 0 : i64, tpu.core_type = #tpu.core_type<tc>, window_params = [{pipeline_mode = #tpu.pipeline_mode<synchronous>, transform_indices = @transform_0, window_bounds = array<i64: 8, 256>}, {transform_indices = @transform_1, window_bounds = array<i64: 4, 4>}, {transform_indices = @transform_2, window_bounds = array<i64: 256, 1024>}, {pipeline_mode = #tpu.pipeline_mode<synchronous>, transform_indices = @transform_3, window_bounds = array<i64: 8, 1>}, {transform_indices = @transform_4, window_bounds = array<i64: 8, 1024>}]} {
    %c0 = arith.constant 0 : index
    %c0_0 = arith.constant 0 : index
    %0 = vector.load %arg1[%c0, %c0_0] : memref<8x256xf32, #tpu.memory_space<vmem>>, vector<8x256xf32>
    %c0_1 = arith.constant 0 : index
    %c0_2 = arith.constant 0 : index
    %1 = memref.load %arg2[%c0_1, %c0_2] : memref<4x4xf32, #tpu.memory_space<smem>>
    %2 = vector.extract_strided_slice %0 {offsets = [0, 0], sizes = [1, 256], strides = [1, 1]} : vector<8x256xf32> to vector<1x256xf32>
    %3 = vector.broadcast %1 : f32 to vector<1x256xf32>
    %4 = arith.mulf %3, %2 : vector<1x256xf32>
    %c0_3 = arith.constant 0 : index
    %c1 = arith.constant 1 : index
    %5 = memref.load %arg2[%c0_3, %c1] : memref<4x4xf32, #tpu.memory_space<smem>>
    %6 = vector.extract_strided_slice %0 {offsets = [1, 0], sizes = [1, 256], strides = [1, 1]} : vector<8x256xf32> to vector<1x256xf32>
    %7 = vector.broadcast %5 : f32 to vector<1x256xf32>
    %8 = arith.mulf %7, %6 : vector<1x256xf32>
    %9 = arith.addf %4, %8 : vector<1x256xf32>
    %c0_4 = arith.constant 0 : index
    %c2 = arith.constant 2 : index
    %10 = memref.load %arg2[%c0_4, %c2] : memref<4x4xf32, #tpu.memory_space<smem>>
    %11 = vector.extract_strided_slice %0 {offsets = [2, 0], sizes = [1, 256], strides = [1, 1]} : vector<8x256xf32> to vector<1x256xf32>
    %12 = vector.broadcast %10 : f32 to vector<1x256xf32>
    %13 = arith.mulf %12, %11 : vector<1x256xf32>
    %14 = arith.addf %9, %13 : vector<1x256xf32>
    %c0_5 = arith.constant 0 : index
    %c3 = arith.constant 3 : index
    %15 = memref.load %arg2[%c0_5, %c3] : memref<4x4xf32, #tpu.memory_space<smem>>
    %16 = vector.extract_strided_slice %0 {offsets = [3, 0], sizes = [1, 256], strides = [1, 1]} : vector<8x256xf32> to vector<1x256xf32>
    %17 = vector.broadcast %15 : f32 to vector<1x256xf32>
    %18 = arith.mulf %17, %16 : vector<1x256xf32>
    %19 = arith.addf %14, %18 : vector<1x256xf32>
    %c1_6 = arith.constant 1 : index
    %c0_7 = arith.constant 0 : index
    %20 = memref.load %arg2[%c1_6, %c0_7] : memref<4x4xf32, #tpu.memory_space<smem>>
    %21 = vector.extract_strided_slice %0 {offsets = [0, 0], sizes = [1, 256], strides = [1, 1]} : vector<8x256xf32> to vector<1x256xf32>
    %22 = vector.broadcast %20 : f32 to vector<1x256xf32>
    %23 = arith.mulf %22, %21 : vector<1x256xf32>
    %c1_8 = arith.constant 1 : index
    %c1_9 = arith.constant 1 : index
    %24 = memref.load %arg2[%c1_8, %c1_9] : memref<4x4xf32, #tpu.memory_space<smem>>
    %25 = vector.extract_strided_slice %0 {offsets = [1, 0], sizes = [1, 256], strides = [1, 1]} : vector<8x256xf32> to vector<1x256xf32>
    %26 = vector.broadcast %24 : f32 to vector<1x256xf32>
    %27 = arith.mulf %26, %25 : vector<1x256xf32>
    %28 = arith.addf %23, %27 : vector<1x256xf32>
    %c1_10 = arith.constant 1 : index
    %c2_11 = arith.constant 2 : index
    %29 = memref.load %arg2[%c1_10, %c2_11] : memref<4x4xf32, #tpu.memory_space<smem>>
    %30 = vector.extract_strided_slice %0 {offsets = [2, 0], sizes = [1, 256], strides = [1, 1]} : vector<8x256xf32> to vector<1x256xf32>
    %31 = vector.broadcast %29 : f32 to vector<1x256xf32>
    %32 = arith.mulf %31, %30 : vector<1x256xf32>
    %33 = arith.addf %28, %32 : vector<1x256xf32>
    %c1_12 = arith.constant 1 : index
    %c3_13 = arith.constant 3 : index
    %34 = memref.load %arg2[%c1_12, %c3_13] : memref<4x4xf32, #tpu.memory_space<smem>>
    %35 = vector.extract_strided_slice %0 {offsets = [3, 0], sizes = [1, 256], strides = [1, 1]} : vector<8x256xf32> to vector<1x256xf32>
    %36 = vector.broadcast %34 : f32 to vector<1x256xf32>
    %37 = arith.mulf %36, %35 : vector<1x256xf32>
    %38 = arith.addf %33, %37 : vector<1x256xf32>
    %c2_14 = arith.constant 2 : index
    %c0_15 = arith.constant 0 : index
    %39 = memref.load %arg2[%c2_14, %c0_15] : memref<4x4xf32, #tpu.memory_space<smem>>
    %40 = vector.extract_strided_slice %0 {offsets = [0, 0], sizes = [1, 256], strides = [1, 1]} : vector<8x256xf32> to vector<1x256xf32>
    %41 = vector.broadcast %39 : f32 to vector<1x256xf32>
    %42 = arith.mulf %41, %40 : vector<1x256xf32>
    %c2_16 = arith.constant 2 : index
    %c1_17 = arith.constant 1 : index
    %43 = memref.load %arg2[%c2_16, %c1_17] : memref<4x4xf32, #tpu.memory_space<smem>>
    %44 = vector.extract_strided_slice %0 {offsets = [1, 0], sizes = [1, 256], strides = [1, 1]} : vector<8x256xf32> to vector<1x256xf32>
    %45 = vector.broadcast %43 : f32 to vector<1x256xf32>
    %46 = arith.mulf %45, %44 : vector<1x256xf32>
    %47 = arith.addf %42, %46 : vector<1x256xf32>
    %c2_18 = arith.constant 2 : index
    %c2_19 = arith.constant 2 : index
    %48 = memref.load %arg2[%c2_18, %c2_19] : memref<4x4xf32, #tpu.memory_space<smem>>
    %49 = vector.extract_strided_slice %0 {offsets = [2, 0], sizes = [1, 256], strides = [1, 1]} : vector<8x256xf32> to vector<1x256xf32>
    %50 = vector.broadcast %48 : f32 to vector<1x256xf32>
    %51 = arith.mulf %50, %49 : vector<1x256xf32>
    %52 = arith.addf %47, %51 : vector<1x256xf32>
    %c2_20 = arith.constant 2 : index
    %c3_21 = arith.constant 3 : index
    %53 = memref.load %arg2[%c2_20, %c3_21] : memref<4x4xf32, #tpu.memory_space<smem>>
    %54 = vector.extract_strided_slice %0 {offsets = [3, 0], sizes = [1, 256], strides = [1, 1]} : vector<8x256xf32> to vector<1x256xf32>
    %55 = vector.broadcast %53 : f32 to vector<1x256xf32>
    %56 = arith.mulf %55, %54 : vector<1x256xf32>
    %57 = arith.addf %52, %56 : vector<1x256xf32>
    %c3_22 = arith.constant 3 : index
    %c0_23 = arith.constant 0 : index
    %58 = memref.load %arg2[%c3_22, %c0_23] : memref<4x4xf32, #tpu.memory_space<smem>>
    %59 = vector.extract_strided_slice %0 {offsets = [0, 0], sizes = [1, 256], strides = [1, 1]} : vector<8x256xf32> to vector<1x256xf32>
    %60 = vector.broadcast %58 : f32 to vector<1x256xf32>
    %61 = arith.mulf %60, %59 : vector<1x256xf32>
    %c3_24 = arith.constant 3 : index
    %c1_25 = arith.constant 1 : index
    %62 = memref.load %arg2[%c3_24, %c1_25] : memref<4x4xf32, #tpu.memory_space<smem>>
    %63 = vector.extract_strided_slice %0 {offsets = [1, 0], sizes = [1, 256], strides = [1, 1]} : vector<8x256xf32> to vector<1x256xf32>
    %64 = vector.broadcast %62 : f32 to vector<1x256xf32>
    %65 = arith.mulf %64, %63 : vector<1x256xf32>
    %66 = arith.addf %61, %65 : vector<1x256xf32>
    %c3_26 = arith.constant 3 : index
    %c2_27 = arith.constant 2 : index
    %67 = memref.load %arg2[%c3_26, %c2_27] : memref<4x4xf32, #tpu.memory_space<smem>>
    %68 = vector.extract_strided_slice %0 {offsets = [2, 0], sizes = [1, 256], strides = [1, 1]} : vector<8x256xf32> to vector<1x256xf32>
    %69 = vector.broadcast %67 : f32 to vector<1x256xf32>
    %70 = arith.mulf %69, %68 : vector<1x256xf32>
    %71 = arith.addf %66, %70 : vector<1x256xf32>
    %c3_28 = arith.constant 3 : index
    %c3_29 = arith.constant 3 : index
    %72 = memref.load %arg2[%c3_28, %c3_29] : memref<4x4xf32, #tpu.memory_space<smem>>
    %73 = vector.extract_strided_slice %0 {offsets = [3, 0], sizes = [1, 256], strides = [1, 1]} : vector<8x256xf32> to vector<1x256xf32>
    %74 = vector.broadcast %72 : f32 to vector<1x256xf32>
    %75 = arith.mulf %74, %73 : vector<1x256xf32>
    %76 = arith.addf %71, %75 : vector<1x256xf32>
    %c0_30 = arith.constant 0 : index
    %c0_31 = arith.constant 0 : index
    %77 = memref.load %arg2[%c0_30, %c0_31] : memref<4x4xf32, #tpu.memory_space<smem>>
    %78 = vector.extract_strided_slice %0 {offsets = [4, 0], sizes = [1, 256], strides = [1, 1]} : vector<8x256xf32> to vector<1x256xf32>
    %79 = vector.broadcast %77 : f32 to vector<1x256xf32>
    %80 = arith.mulf %79, %78 : vector<1x256xf32>
    %c0_32 = arith.constant 0 : index
    %c1_33 = arith.constant 1 : index
    %81 = memref.load %arg2[%c0_32, %c1_33] : memref<4x4xf32, #tpu.memory_space<smem>>
    %82 = vector.extract_strided_slice %0 {offsets = [5, 0], sizes = [1, 256], strides = [1, 1]} : vector<8x256xf32> to vector<1x256xf32>
    %83 = vector.broadcast %81 : f32 to vector<1x256xf32>
    %84 = arith.mulf %83, %82 : vector<1x256xf32>
    %85 = arith.addf %80, %84 : vector<1x256xf32>
    %c0_34 = arith.constant 0 : index
    %c2_35 = arith.constant 2 : index
    %86 = memref.load %arg2[%c0_34, %c2_35] : memref<4x4xf32, #tpu.memory_space<smem>>
    %87 = vector.extract_strided_slice %0 {offsets = [6, 0], sizes = [1, 256], strides = [1, 1]} : vector<8x256xf32> to vector<1x256xf32>
    %88 = vector.broadcast %86 : f32 to vector<1x256xf32>
    %89 = arith.mulf %88, %87 : vector<1x256xf32>
    %90 = arith.addf %85, %89 : vector<1x256xf32>
    %c0_36 = arith.constant 0 : index
    %c3_37 = arith.constant 3 : index
    %91 = memref.load %arg2[%c0_36, %c3_37] : memref<4x4xf32, #tpu.memory_space<smem>>
    %92 = vector.extract_strided_slice %0 {offsets = [7, 0], sizes = [1, 256], strides = [1, 1]} : vector<8x256xf32> to vector<1x256xf32>
    %93 = vector.broadcast %91 : f32 to vector<1x256xf32>
    %94 = arith.mulf %93, %92 : vector<1x256xf32>
    %95 = arith.addf %90, %94 : vector<1x256xf32>
    %c1_38 = arith.constant 1 : index
    %c0_39 = arith.constant 0 : index
    %96 = memref.load %arg2[%c1_38, %c0_39] : memref<4x4xf32, #tpu.memory_space<smem>>
    %97 = vector.extract_strided_slice %0 {offsets = [4, 0], sizes = [1, 256], strides = [1, 1]} : vector<8x256xf32> to vector<1x256xf32>
    %98 = vector.broadcast %96 : f32 to vector<1x256xf32>
    %99 = arith.mulf %98, %97 : vector<1x256xf32>
    %c1_40 = arith.constant 1 : index
    %c1_41 = arith.constant 1 : index
    %100 = memref.load %arg2[%c1_40, %c1_41] : memref<4x4xf32, #tpu.memory_space<smem>>
    %101 = vector.extract_strided_slice %0 {offsets = [5, 0], sizes = [1, 256], strides = [1, 1]} : vector<8x256xf32> to vector<1x256xf32>
    %102 = vector.broadcast %100 : f32 to vector<1x256xf32>
    %103 = arith.mulf %102, %101 : vector<1x256xf32>
    %104 = arith.addf %99, %103 : vector<1x256xf32>
    %c1_42 = arith.constant 1 : index
    %c2_43 = arith.constant 2 : index
    %105 = memref.load %arg2[%c1_42, %c2_43] : memref<4x4xf32, #tpu.memory_space<smem>>
    %106 = vector.extract_strided_slice %0 {offsets = [6, 0], sizes = [1, 256], strides = [1, 1]} : vector<8x256xf32> to vector<1x256xf32>
    %107 = vector.broadcast %105 : f32 to vector<1x256xf32>
    %108 = arith.mulf %107, %106 : vector<1x256xf32>
    %109 = arith.addf %104, %108 : vector<1x256xf32>
    %c1_44 = arith.constant 1 : index
    %c3_45 = arith.constant 3 : index
    %110 = memref.load %arg2[%c1_44, %c3_45] : memref<4x4xf32, #tpu.memory_space<smem>>
    %111 = vector.extract_strided_slice %0 {offsets = [7, 0], sizes = [1, 256], strides = [1, 1]} : vector<8x256xf32> to vector<1x256xf32>
    %112 = vector.broadcast %110 : f32 to vector<1x256xf32>
    %113 = arith.mulf %112, %111 : vector<1x256xf32>
    %114 = arith.addf %109, %113 : vector<1x256xf32>
    %c2_46 = arith.constant 2 : index
    %c0_47 = arith.constant 0 : index
    %115 = memref.load %arg2[%c2_46, %c0_47] : memref<4x4xf32, #tpu.memory_space<smem>>
    %116 = vector.extract_strided_slice %0 {offsets = [4, 0], sizes = [1, 256], strides = [1, 1]} : vector<8x256xf32> to vector<1x256xf32>
    %117 = vector.broadcast %115 : f32 to vector<1x256xf32>
    %118 = arith.mulf %117, %116 : vector<1x256xf32>
    %c2_48 = arith.constant 2 : index
    %c1_49 = arith.constant 1 : index
    %119 = memref.load %arg2[%c2_48, %c1_49] : memref<4x4xf32, #tpu.memory_space<smem>>
    %120 = vector.extract_strided_slice %0 {offsets = [5, 0], sizes = [1, 256], strides = [1, 1]} : vector<8x256xf32> to vector<1x256xf32>
    %121 = vector.broadcast %119 : f32 to vector<1x256xf32>
    %122 = arith.mulf %121, %120 : vector<1x256xf32>
    %123 = arith.addf %118, %122 : vector<1x256xf32>
    %c2_50 = arith.constant 2 : index
    %c2_51 = arith.constant 2 : index
    %124 = memref.load %arg2[%c2_50, %c2_51] : memref<4x4xf32, #tpu.memory_space<smem>>
    %125 = vector.extract_strided_slice %0 {offsets = [6, 0], sizes = [1, 256], strides = [1, 1]} : vector<8x256xf32> to vector<1x256xf32>
    %126 = vector.broadcast %124 : f32 to vector<1x256xf32>
    %127 = arith.mulf %126, %125 : vector<1x256xf32>
    %128 = arith.addf %123, %127 : vector<1x256xf32>
    %c2_52 = arith.constant 2 : index
    %c3_53 = arith.constant 3 : index
    %129 = memref.load %arg2[%c2_52, %c3_53] : memref<4x4xf32, #tpu.memory_space<smem>>
    %130 = vector.extract_strided_slice %0 {offsets = [7, 0], sizes = [1, 256], strides = [1, 1]} : vector<8x256xf32> to vector<1x256xf32>
    %131 = vector.broadcast %129 : f32 to vector<1x256xf32>
    %132 = arith.mulf %131, %130 : vector<1x256xf32>
    %133 = arith.addf %128, %132 : vector<1x256xf32>
    %c3_54 = arith.constant 3 : index
    %c0_55 = arith.constant 0 : index
    %134 = memref.load %arg2[%c3_54, %c0_55] : memref<4x4xf32, #tpu.memory_space<smem>>
    %135 = vector.extract_strided_slice %0 {offsets = [4, 0], sizes = [1, 256], strides = [1, 1]} : vector<8x256xf32> to vector<1x256xf32>
    %136 = vector.broadcast %134 : f32 to vector<1x256xf32>
    %137 = arith.mulf %136, %135 : vector<1x256xf32>
    %c3_56 = arith.constant 3 : index
    %c1_57 = arith.constant 1 : index
    %138 = memref.load %arg2[%c3_56, %c1_57] : memref<4x4xf32, #tpu.memory_space<smem>>
    %139 = vector.extract_strided_slice %0 {offsets = [5, 0], sizes = [1, 256], strides = [1, 1]} : vector<8x256xf32> to vector<1x256xf32>
    %140 = vector.broadcast %138 : f32 to vector<1x256xf32>
    %141 = arith.mulf %140, %139 : vector<1x256xf32>
    %142 = arith.addf %137, %141 : vector<1x256xf32>
    %c3_58 = arith.constant 3 : index
    %c2_59 = arith.constant 2 : index
    %143 = memref.load %arg2[%c3_58, %c2_59] : memref<4x4xf32, #tpu.memory_space<smem>>
    %144 = vector.extract_strided_slice %0 {offsets = [6, 0], sizes = [1, 256], strides = [1, 1]} : vector<8x256xf32> to vector<1x256xf32>
    %145 = vector.broadcast %143 : f32 to vector<1x256xf32>
    %146 = arith.mulf %145, %144 : vector<1x256xf32>
    %147 = arith.addf %142, %146 : vector<1x256xf32>
    %c3_60 = arith.constant 3 : index
    %c3_61 = arith.constant 3 : index
    %148 = memref.load %arg2[%c3_60, %c3_61] : memref<4x4xf32, #tpu.memory_space<smem>>
    %149 = vector.extract_strided_slice %0 {offsets = [7, 0], sizes = [1, 256], strides = [1, 1]} : vector<8x256xf32> to vector<1x256xf32>
    %150 = vector.broadcast %148 : f32 to vector<1x256xf32>
    %151 = arith.mulf %150, %149 : vector<1x256xf32>
    %152 = arith.addf %147, %151 : vector<1x256xf32>
    %153 = tpu.concatenate %19, %38, %57, %76, %95, %114, %133, %152 in 0 : vector<1x256xf32>, vector<1x256xf32>, vector<1x256xf32>, vector<1x256xf32>, vector<1x256xf32>, vector<1x256xf32>, vector<1x256xf32>, vector<1x256xf32> -> vector<8x256xf32>
    %154 = arith.truncf %153 : vector<8x256xf32> to vector<8x256xbf16>
    %c0_62 = arith.constant 0 : index
    %c0_63 = arith.constant 0 : index
    %155 = vector.load %arg3[%c0_62, %c0_63] : memref<256x1024xbf16, #tpu.memory_space<vmem>>, vector<256x1024xbf16>
    %cst = arith.constant dense<0.000000e+00> : vector<8x1024xf32>
    %156 = tpu.matmul %154, %155, %cst {dimension_numbers = #tpu.dot_dimension_numbers<[1], [0], [0], [1], [0, 0, 1, 1], [], []>} : vector<8x256xbf16>, vector<256x1024xbf16>, vector<8x1024xf32> -> vector<8x1024xf32>
    %c0_64 = arith.constant 0 : index
    %c0_65 = arith.constant 0 : index
    %157 = vector.load %arg4[%c0_64, %c0_65] : memref<8x1xf32, #tpu.memory_space<vmem>>, vector<8x1xf32>
    %158 = vector.broadcast %157 : vector<8x1xf32> to vector<8x1024xf32>
    %159 = arith.addf %156, %158 : vector<8x1024xf32>
    %c0_66 = arith.constant 0 : index
    %c0_67 = arith.constant 0 : index
    %160 = vector.load %arg5[%c0_66, %c0_67] : memref<8x1024xf32, #tpu.memory_space<vmem>>, vector<8x1024xf32>
    tpu.vector_store %arg5[%c0_66, %c0_67], %159 {strides = array<i32>} : memref<8x1024xf32, #tpu.memory_space<vmem>>, vector<8x1024xf32>,
    return
  }
  func.func @transform_0(%arg0: i32) -> (i32, i32) {
    %c0_i32 = arith.constant 0 : i32
    %c0_i32_0 = arith.constant 0 : i32
    %c0_i32_1 = arith.constant 0 : i32
    return %c0_i32, %c0_i32_0 : i32, i32
  }
  func.func @transform_1(%arg0: i32) -> (i32, i32) {
    %c0_i32 = arith.constant 0 : i32
    %c0_i32_0 = arith.constant 0 : i32
    %c0_i32_1 = arith.constant 0 : i32
    return %c0_i32, %c0_i32_0 : i32, i32
  }
  func.func @transform_2(%arg0: i32) -> (i32, i32) {
    %c0_i32 = arith.constant 0 : i32
    %c0_i32_0 = arith.constant 0 : i32
    return %c0_i32, %arg0 : i32, i32
  }
  func.func @transform_3(%arg0: i32) -> (i32, i32) {
    %c0_i32 = arith.constant 0 : i32
    %c0_i32_0 = arith.constant 0 : i32
    %c0_i32_1 = arith.constant 0 : i32
    return %c0_i32, %c0_i32_0 : i32, i32
  }
  func.func @transform_4(%arg0: i32) -> (i32, i32) {
    %c0_i32 = arith.constant 0 : i32
    %c0_i32_0 = arith.constant 0 : i32
    return %c0_i32, %arg0 : i32, i32
  }
}

</mosaic_0001>

<bundles_post_ra>
// kernel: tpu_custom_call.1
= control target key start
LH: loop header
LB: loop body
LE: loop exit
PB: predicated region body
PF: predicated region fallthrough
CT: control target
= control target key end

     0   :  { %9 = vsyncpa [#allocation3], 0  ;;  %s1935_s0 = inlined_call_operand.hbm [shape: f32[8,256], index: 0, kind: input, shape index: {}]   ;;  %s1936_s1 = inlined_call_operand.vmem [shape: f32[4,4], index: 1, kind: input, shape index: {}]   ;;  %s1937_s2 = inlined_call_operand.hbm [shape: bf16[256,1024], index: 2, kind: input, shape index: {}]   ;;  %s1938_s3 = inlined_call_operand.vmem [shape: f32[8,1], index: 3, kind: input, shape index: {}]   ;;  %s1939_s4 = inlined_call_operand.hbm [shape: f32[8,1024], index: 4, kind: output, shape index: {}]  }
   0x1   :  { %10 = vsyncpa [#allocation5], 0 }
   0x2   :  { %11 = vsyncpa [#allocation8], 0 }
   0x3   :  { %12 = vsyncpa [#allocation4], 0  ;;  %s29_s17 = sshll.u32 %s1936_s1, 4  ;;  %s1460_s18 = smov [#allocation2]   ;;  %s30_s17 = int_to_ptr.vmem [resolvable:$true] %s29_s17 }
   0x4   :  { %s19_s19 = sshll.u32 %s1460_s18, 4  ;;  %s1374_s22 = scalar_lea.hbm %s1935_s0, 256  ;;  %s20_s19 = int_to_ptr.vmem [resolvable:$true] %s19_s19 }
   0x5   :  { %p1375_p0 = scmp.ne.s32.totalorder %s1935_s0, %s1374_s22  ;;  %p1378_p1 = scmp.lt.u32.totalorder %s1374_s22, %s1935_s0 }
   0x7   :  { %p1380_p2 = pnand %p1378_p1, %p1375_p0 }
   0x9   :  { %1383 = shalt.err (!%p1380_p2)
}
   0xa   :  { %s1384_s27 = scalar_lea.vmem %s20_s19, 256  ;;  %p1389_p4 = scmp.lt.s32.totalorder %s20_s19, %s20_s19 }
   0xb   :  { %p1385_p3 = scmp.ne.s32.totalorder %s20_s19, %s1384_s27  ;;  %p1390_p5 = scmp.lt.s32.totalorder %s1384_s27, %s1384_s27 }
   0xd   :  { %p1391_p6 = por %p1390_p5, %p1389_p4 }
   0xf   :  { %p1392_p7 = pnand %p1391_p6, %p1385_p3 }
  0x11   :  { %1395 = shalt.err (!%p1392_p7)
}
  0x12   :  { %22 = dma.hbm_to_vmem [thread:$0]  %s1935_s0, 256, %s20_s19, [#allocation3]  }
  0x13   :  { %s1396_s29 = scalar_lea.vmem %s30_s17, 64  ;;  %p1401_p9 = scmp.lt.s32.totalorder %s30_s17, %s30_s17 }
  0x14   :  { %p1397_p8 = scmp.ne.s32.totalorder %s30_s17, %s1396_s29  ;;  %p1402_p10 = scmp.lt.s32.totalorder %s1396_s29, %s1396_s29 }
  0x16   :  { %p1403_p11 = por %p1402_p10, %p1401_p9 }
  0x18   :  { %p1404_p12 = pnand %p1403_p11, %p1397_p8 }
  0x1a   :  { %1407 = shalt.err (!%p1404_p12)
}
  0x1b   :  { %s1461_s30 = smov [#allocation6]   ;;  %s1462_s5 = smov [#allocation7]  }
  0x1c   :  { %32 = dma.vmem_to_smem %s30_s17, 64, %s1461_s30, [#allocation5]  }
  0x1d   :  { %s38_s6 = sshll.u32 %s1462_s5, 4  ;;  %s1408_s9 = scalar_lea.hbm %s1937_s2, 16384  ;;  %s39_s6 = int_to_ptr.vmem [resolvable:$true] %s38_s6 }
  0x1e   :  { %p1409_p13 = scmp.ne.s32.totalorder %s1937_s2, %s1408_s9  ;;  %p1412_p0 = scmp.lt.u32.totalorder %s1408_s9, %s1937_s2 }
  0x20   :  { %p1414_p1 = pnand %p1412_p0, %p1409_p13 }
  0x22   :  { %1417 = shalt.err (!%p1414_p1)
}
  0x23   :  { %s1418_s13 = scalar_lea.vmem %s39_s6, 16384  ;;  %p1423_p3 = scmp.lt.s32.totalorder %s39_s6, %s39_s6 }
  0x24   :  { %p1419_p2 = scmp.ne.s32.totalorder %s39_s6, %s1418_s13  ;;  %p1424_p4 = scmp.lt.s32.totalorder %s1418_s13, %s1418_s13 }
  0x26   :  { %p1425_p5 = por %p1424_p4, %p1423_p3 }
  0x28   :  { %p1426_p6 = pnand %p1425_p5, %p1419_p2 }
  0x2a   :  { %1429 = shalt.err (!%p1426_p6)
}
  0x2b   :  { %s1463_s14 = smov 512   ;;  %s1464_s15 = smov 32  }
  0x2c   :  { %44 = dma.hbm_to_vmem [thread:$0]  %s1937_s2, 16384, %s39_s6, [#allocation8], %s1463_s14, %s1463_s14, %s1464_s15  }
  0x2d   :  { %1452 = dma.done.wait [#allocation3], 256  }
  0x2e   :  { %1453 = vsyncadd [#allocation3], 4294967040 }
  0x2f   :  { %1454 = dma.done.wait [#allocation5], 64  }
  0x30   :  { %1455 = vsyncadd [#allocation5], 4294967232 }
  0x31   :  { %1456 = dma.done.wait [#allocation8], 16384  }
  0x32   :  { %1457 = vsyncadd [#allocation8], 4294950912 }
  0x33   :  { %56 = sfence }
  0x34   :  { %v260_v0 = vld [vmem:[#allocation7] sm:$0xff]  ;;  %v261_v2 = vld [vmem:[#allocation7 + $0x8] sm:$0xff]  ;;  %s1521_s2 = sld [smem:[#allocation6]]  ;;  %s1523_s18 = sld [smem:[#allocation6 + $0x1]]  ;;  %vm237_vm0 = vcmask 1040384   ;;  %vm240_vm1 = vcmask 1041408  }
  0x35   :  { %v264_v1 = vld [vmem:[#allocation7 + $0x20] sm:$0xff]  ;;  %v265_v4 = vld [vmem:[#allocation7 + $0x28] sm:$0xff]  ;;  %s1529_s19 = sld [smem:[#allocation6 + $0x2]]  ;;  %s1531_s20 = sld [smem:[#allocation6 + $0x3]]  ;;  %vm243_vm2 = vcmask 1042432   ;;  %vm246_vm3 = vcmask 1043456  }
  0x36   :  { %v1239_v3 = vcombine.high %v260_v0, %v264_v1  ;;  %v1238_v5 = vcombine.low %v260_v0, %v264_v1  ;;  %v268_v6 = vld [vmem:[#allocation7 + $0x40] sm:$0xff]  ;;  %v1241_v8 = vcombine.high %v261_v2, %v265_v4  ;;  %v1240_v9 = vcombine.low %v261_v2, %v265_v4  ;;  %v269_v11 = vld [vmem:[#allocation7 + $0x48] sm:$0xff]  ;;  %s1540_s21 = sld [smem:[#allocation6 + $0x80]]  ;;  %s1548_s22 = sld [smem:[#allocation6 + $0x81]] }
  0x37   :  { %v272_v7 = vld [vmem:[#allocation7 + $0x60] sm:$0xff]  ;;  %v273_v12 = vld [vmem:[#allocation7 + $0x68] sm:$0xff]  ;;  %s1556_s23 = sld [smem:[#allocation6 + $0x82]]  ;;  %s1567_s24 = sld [smem:[#allocation6 + $0x83]]  ;;  %vm249_vm4 = vcmask 1044480   ;;  %vm252_vm5 = vcmask 1045504  }
  0x38   :  { %v1247_v10 = vcombine.high %v268_v6, %v272_v7  ;;  %v276_v13 = vld [vmem:[#allocation7 + $0x80] sm:$0xff]  ;;  %1034 = vmatprep.subr.bf16.mxu0 %v1239_v3  ;;  %v1249_v14 = vcombine.high %v269_v11, %v273_v12  ;;  %v1519_v16 = vld [vmem:[#allocation7 + $0x88] sm:$0xff]  ;;  %1075 = vmatprep.subr.bf16.mxu1 %v1241_v8  ;;  %v1246_v18 = vcombine.low %v268_v6, %v272_v7  ;;  %s1579_s25 = sld [smem:[#allocation6 + $0x100]]  ;;  %s1595_s26 = sld [smem:[#allocation6 + $0x101]]  ;;  %vm255_vm6 = vcmask 1046528  }
  0x39   :  { %v280_v15 = vld [vmem:[#allocation7 + $0xa0] sm:$0xff]  ;;  %v281_v17 = vld [vmem:[#allocation7 + $0xa8] sm:$0xff]  ;;  %1035 = vmatpush1.bf16.msra.mxu0 %v1238_v5  ;;  %1076 = vmatpush1.bf16.msra.mxu1 %v1240_v9  ;;  %v1248_v19 = vcombine.low %v269_v11, %v273_v12  ;;  %s1608_s27 = sld [smem:[#allocation6 + $0x102]]  ;;  %s1610_s1 = sld [smem:[#allocation6 + $0x103]] }
  0x3a   :  { %1036 = vmatprep.subr.bf16.mxu0 %v1247_v10  ;;  %v1255_v20 = vcombine.high %v276_v13, %v280_v15  ;;  %v1525_v21 = vld [vmem:[#allocation7 + $0xc0] sm:$0xff]  ;;  %1077 = vmatprep.subr.bf16.mxu1 %v1249_v14  ;;  %v1257_v23 = vcombine.high %v1519_v16, %v281_v17  ;;  %v1534_v24 = vld [vmem:[#allocation7 + $0xc8] sm:$0xff]  ;;  %v1254_v30 = vcombine.low %v276_v13, %v280_v15  ;;  %v60_v56 = vstv %s1521_s2  ;;  %s1623_s28 = sld [smem:[#allocation6 + $0x180]]  ;;  %s1625_s29 = sld [smem:[#allocation6 + $0x181]] }
  0x3b   :  { %v1527_v22 = vld [vmem:[#allocation7 + $0xe0] sm:$0xff]  ;;  %v1536_v25 = vld [vmem:[#allocation7 + $0xe8] sm:$0xff]  ;;  %v1256_v34 = vcombine.low %v1519_v16, %v281_v17  ;;  %v64_v62 = vstv %s1523_s18  ;;  %v76_v3 = vstv %s1529_s19  ;;  %v88_v4 = vstv %s1531_s20  ;;  %s1637_s30 = sld [smem:[#allocation6 + $0x182]]  ;;  %s1653_s5 = sld [smem:[#allocation6 + $0x183]] }
  0x3c   :  { %v1538_v26 = vld [vmem:[#allocation7 + $0x100] sm:$0xff]  ;;  %v1544_v28 = vld [vmem:[#allocation7 + $0x108] sm:$0xff]  ;;  %v1263_v35 = vcombine.high %v1525_v21, %v1527_v22  ;;  %v1265_v39 = vcombine.high %v1534_v24, %v1536_v25  ;;  %v1262_v40 = vcombine.low %v1525_v21, %v1527_v22  ;;  %v1264_v44 = vcombine.low %v1534_v24, %v1536_v25 }
  0x3d   :  { %v1542_v27 = vld [vmem:[#allocation7 + $0x120] sm:$0xff]  ;;  %v1546_v29 = vld [vmem:[#allocation7 + $0x128] sm:$0xff]  ;;  %1037 = vmatpush1.bf16.msra.mxu0 %v1246_v18  ;;  %1078 = vmatpush1.bf16.msra.mxu1 %v1248_v19  ;;  %v100_v18 = vstv %s1540_s21  ;;  %v104_v24 = vstv %s1548_s22 }
  0x3e   :  { %v1550_v31 = vld [vmem:[#allocation7 + $0x140] sm:$0xff]  ;;  %v1554_v33 = vld [vmem:[#allocation7 + $0x148] sm:$0xff]  ;;  %1038 = vmatprep.subr.bf16.mxu0 %v1255_v20  ;;  %1079 = vmatprep.subr.bf16.mxu1 %v1257_v23  ;;  %v1271_v45 = vcombine.high %v1538_v26, %v1542_v27  ;;  %v1273_v46 = vcombine.high %v1544_v28, %v1546_v29  ;;  %v1270_v47 = vcombine.low %v1538_v26, %v1542_v27  ;;  %v58_v26 = vld [vmem:[#allocation2 + $0x8] sm:$0xff] }
  0x3f   :  { %v1552_v32 = vld [vmem:[#allocation7 + $0x160] sm:$0xff]  ;;  %v1561_v36 = vld [vmem:[#allocation7 + $0x168] sm:$0xff]  ;;  %v1272_v51 = vcombine.low %v1544_v28, %v1546_v29  ;;  %v156_v27 = vstv %s1608_s27  ;;  %v62_v28 = vmul.f32 %v60_v56, %v58_v26  ;;  %v66_v29 = vmul.f32 %v64_v62, %v58_v26 }
  0x40   :  { %v1563_v37 = vld [vmem:[#allocation7 + $0x180] sm:$0xff]  ;;  %v1573_v41 = vld [vmem:[#allocation7 + $0x188] sm:$0xff]  ;;  %v1279_v52 = vcombine.high %v1550_v31, %v1552_v32  ;;  %v1281_v53 = vcombine.high %v1554_v33, %v1561_v36  ;;  %v1278_v57 = vcombine.low %v1550_v31, %v1552_v32  ;;  %v1280_v58 = vcombine.low %v1554_v33, %v1561_v36 }
  0x41   :  { %v1565_v38 = vld [vmem:[#allocation7 + $0x1a0] sm:$0xff]  ;;  %v1575_v42 = vld [vmem:[#allocation7 + $0x1a8] sm:$0xff]  ;;  %1039 = vmatpush1.bf16.msra.mxu0 %v1254_v30  ;;  %1080 = vmatpush1.bf16.msra.mxu1 %v1256_v34  ;;  %v116_v34 = vstv %s1556_s23  ;;  %v90_v30 = vmul.f32 %v88_v4, %v58_v26  ;;  %v102_v25 = vmul.f32 %v100_v18, %v58_v26  ;;  %v106_v21 = vmul.f32 %v104_v24, %v58_v26 }
  0x42   :  { %v1577_v43 = vld [vmem:[#allocation7 + $0x1c0] sm:$0xff]  ;;  %v1591_v49 = vld [vmem:[#allocation7 + $0x1c8] sm:$0xff]  ;;  %1040 = vmatprep.subr.bf16.mxu0 %v1263_v35  ;;  %v1287_v59 = vcombine.high %v1563_v37, %v1565_v38  ;;  %1081 = vmatprep.subr.bf16.mxu1 %v1265_v39  ;;  %v1289_v63 = vcombine.high %v1573_v41, %v1575_v42  ;;  %v1286_v0 = vcombine.low %v1563_v37, %v1565_v38  ;;  %v1941_v35 = vstv %s1567_s24 }
  0x43   :  { %v1589_v48 = vld [vmem:[#allocation7 + $0x1e0] sm:$0xff]  ;;  %v1593_v50 = vld [vmem:[#allocation7 + $0x1e8] sm:$0xff]  ;;  %v1288_v5 = vcombine.low %v1573_v41, %v1575_v42  ;;  %v1940_v39 = vstv %s1579_s25  ;;  %v118_v20 = vmul.f32 %v116_v34, %v58_v26  ;;  %v130_v19 = vmul.f32 %v1941_v35, %v58_v26 }
  0x44   :  { %v1603_v54 = vld [vmem:[#allocation7 + $0x200] sm:$0xff]  ;;  %v1618_v60 = vld [vmem:[#allocation7 + $0x208] sm:$0xff]  ;;  %v1295_v6 = vcombine.high %v1577_v43, %v1589_v48  ;;  %v1297_v7 = vcombine.high %v1591_v49, %v1593_v50  ;;  %v1294_v8 = vcombine.low %v1577_v43, %v1589_v48  ;;  %v1296_v12 = vcombine.low %v1591_v49, %v1593_v50 }
  0x45   :  { %v1605_v55 = vld [vmem:[#allocation7 + $0x220] sm:$0xff]  ;;  %v1620_v61 = vld [vmem:[#allocation7 + $0x228] sm:$0xff]  ;;  %1041 = vmatpush1.bf16.msra.mxu0 %v1262_v40  ;;  %1082 = vmatpush1.bf16.msra.mxu1 %v1264_v44  ;;  %v1942_v44 = vstv %s1595_s26  ;;  %v180_v40 = vstv %s1623_s28  ;;  %v142_v14 = vmul.f32 %v1940_v39, %v58_v26  ;;  %v94_v32 = vrot.slane %v90_v30, 3 }
  0x46   :  { %v1631_v1 = vld [vmem:[#allocation7 + $0x240] sm:$0xff]  ;;  %v1647_v9 = vld [vmem:[#allocation7 + $0x248] sm:$0xff]  ;;  %v1303_v13 = vcombine.high %v1603_v54, %v1605_v55  ;;  %1042 = vmatprep.subr.bf16.mxu0 %v1271_v45  ;;  %1083 = vmatprep.subr.bf16.mxu1 %v1273_v46  ;;  %v184_v46 = vstv %s1625_s29  ;;  %v208_v45 = vstv %s1653_s5  ;;  %v122_v33 = vrot.slane %v118_v20, 2 }
  0x47   :  { %v1633_v2 = vld [vmem:[#allocation7 + $0x260] sm:$0xff]  ;;  %v1649_v10 = vld [vmem:[#allocation7 + $0x268] sm:$0xff]  ;;  %v134_v36 = vrot.slane %v130_v19, 3  ;;  %v186_v20 = vmul.f32 %v184_v46, %v58_v26  ;;  %v210_v37 = vmul.f32 %v208_v45, %v58_v26  ;;  %v1943_v49 = vcombine.high %v1618_v60, %v1620_v61 }
  0x48   :  { %v1651_v11 = vld [vmem:[#allocation7 + $0x280] sm:$0xff]  ;;  %v1663_v16 = vld [vmem:[#allocation7 + $0x288] sm:$0xff] }
  0x49   :  { %v1661_v15 = vld [vmem:[#allocation7 + $0x2a0] sm:$0xff]  ;;  %v1665_v17 = vld [vmem:[#allocation7 + $0x2a8] sm:$0xff]  ;;  %1043 = vmatpush1.bf16.msra.mxu0 %v1270_v47  ;;  %1084 = vmatpush1.bf16.msra.mxu1 %v1272_v51  ;;  %v168_v47 = vstv %s1610_s1  ;;  %v196_v51 = vstv %s1637_s30  ;;  %v190_v42 = vrot.slane %v186_v20, 1  ;;  %v1949_v20 = vstv %s1595_s26 }
  0x4a   :  { %v1674_v22 = vld [vmem:[#allocation7 + $0x2c0] sm:$0xff]  ;;  %1044 = vmatprep.subr.bf16.mxu0 %v1279_v52  ;;  %1085 = vmatprep.subr.bf16.mxu1 %v1281_v53  ;;  %v78_v52 = vmul.f32 %v76_v3, %v58_v26  ;;  %v70_v53 = vrot.slane %v66_v29, 1  ;;  %v146_v29 = vmul.f32 %v1942_v44, %v58_v26  ;;  %v1751_v35 = vld [vmem:[#allocation7 + $0x2c8] sm:$0xff]  ;;  %v182_v44 = vmul.f32 %v180_v40, %v58_v26 }
  0x4b   :  { %v1676_v23 = vld [vmem:[#allocation7 + $0x2e0] sm:$0xff] }
  0x4c   :  { %v82_v31 = vrot.slane %v78_v52, 2  ;;  %v74_v39 = vadd.f32 %v70_v53, %v62_v28  ;;  %v150_v30 = vrot.slane %v146_v29, 1  ;;  %v170_v52 = vmul.f32 %v168_v47, %v58_v26 }
  0x4d   :  { %1045 = vmatpush1.bf16.msra.mxu0 %v1278_v57  ;;  %1086 = vmatpush1.bf16.msra.mxu1 %v1280_v58  ;;  %v110_v57 = vrot.slane %v106_v21, 1  ;;  %v158_v58 = vmul.f32 %v156_v27, %v58_v26  ;;  %v198_v28 = vmul.f32 %v196_v51, %v58_v26  ;;  %v1326_v41 = vcombine.low %v1674_v22, %v1676_v23 }
  0x4e   :  { %1046 = vmatprep.subr.bf16.mxu0 %v1287_v59  ;;  %1087 = vmatprep.subr.bf16.mxu1 %v1289_v63  ;;  %v1753_v59 = vld [vmem:[#allocation7 + $0x2e8] sm:$0xff]  ;;  %v86_v63 = vadd.f32 %v82_v31, %v74_v39  ;;  %v154_v53 = vadd.f32 %v150_v30, %v142_v14  ;;  %v214_v39 = vrot.slane %v210_v37, 3  ;;  %v194_v26 = vadd.f32 %v190_v42, %v182_v44 }
  0x4f   :  { %v114_v21 = vadd.f32 %v110_v57, %v102_v25  ;;  %v162_v19 = vrot.slane %v158_v58, 2  ;;  %v174_v57 = vrot.slane %v170_v52, 3  ;;  %v1329_v38 = vcombine.high %v1751_v35, %v1753_v59 }
  0x50   :  { %v1945_v30 = vstv %s1567_s24  ;;  %v1946_v52 = vcombine.low %v1618_v60, %v1620_v61 }
  0x51   :  { %1047 = vmatpush1.bf16.msra.mxu0 %v1286_v0  ;;  %1088 = vmatpush1.bf16.msra.mxu1 %v1288_v5  ;;  %v126_v25 = vadd.f32 %v122_v33, %v114_v21  ;;  %v202_v0 = vrot.slane %v198_v28, 2  ;;  %v98_v5 = vadd.f32 %v94_v32, %v86_v63  ;;  %v166_v14 = vadd.f32 %v162_v19, %v154_v53 }
  0x52   :  { %1048 = vmatprep.subr.bf16.mxu0 %v1295_v6  ;;  %1089 = vmatprep.subr.bf16.mxu1 %v1297_v7  ;;  %v1783_v7 = vld [vmem:[#allocation2] sm:$0xff]  ;;  %v1948_v63 = vstv %s1579_s25 }
  0x53   :  { %v1781_v6 = vadd.f32 %v134_v36, %v126_v25  ;;  %v61_v31 = vmul.f32 %v60_v56, %v1783_v7  ;;  %v65_v32 = vmul.f32 %v64_v62, %v1783_v7  ;;  %v77_v29 = vmul.f32 %v76_v3, %v1783_v7 }
  0x54   :  { %v178_v43 = vadd.f32 %v174_v57, %v166_v14  ;;  %v89_v56 = vmul.f32 %v88_v4, %v1783_v7  ;;  %v101_v62 = vmul.f32 %v100_v18, %v1783_v7  ;;  %v206_v50 = vadd.f32 %v202_v0, %v194_v26 }
  0x55   :  { %1049 = vmatpush1.bf16.msra.mxu0 %v1294_v8  ;;  %1090 = vmatpush1.bf16.msra.mxu1 %v1296_v12  ;;  %v222_v48 = vrot.slane %v1781_v6, 7  ;;  %v69_v3 = vrot.slane %v65_v32, 1  ;;  %v81_v8 = vrot.slane %v77_v29, 2  ;;  %v105_v12 = vmul.f32 %v104_v24, %v1783_v7 }
  0x56   :  { %1050 = vmatprep.subr.bf16.mxu0 %v1303_v13  ;;  %1091 = vmatprep.subr.bf16.mxu1 %v1943_v49  ;;  %v228_v13 = vrot.slane %v178_v43, 6  ;;  %v93_v33 = vrot.slane %v89_v56, 3  ;;  %v117_v4 = vmul.f32 %v116_v34, %v1783_v7  ;;  %v1944_v18 = vcombine.low %v1603_v54, %v1605_v55  ;;  %v356_v56 = vld [vmem:[#allocation7 + $0x300] sm:$0xff] }
  0x57   :  { %v239_v44 = vsel %vm237_vm0, %v98_v5, %v222_v48  ;;  %v218_v36 = vadd.f32 %v214_v39, %v206_v50  ;;  %v73_v58 = vadd.f32 %v69_v3, %v61_v31  ;;  %v109_v21 = vrot.slane %v105_v12, 1  ;;  %v357_v50 = vld [vmem:[#allocation7 + $0x308] sm:$0xff] }
  0x58   :  { %v129_v24 = vmul.f32 %v1945_v30, %v1783_v7  ;;  %v1947_v34 = vcombine.high %v1631_v1, %v1633_v2  ;;  %v242_v54 = vsel %vm240_vm1, %v239_v44, %v228_v13  ;;  %v121_v55 = vrot.slane %v117_v4, 2  ;;  %v361_v3 = vld [vmem:[#allocation7 + $0x328] sm:$0xff]  ;;  %v368_v30 = vld [vmem:[#allocation7 + $0x360] sm:$0xff] }
  0x59   :  { %1051 = vmatpush1.bf16.msra.mxu0 %v1944_v18  ;;  %1092 = vmatpush1.bf16.msra.mxu1 %v1946_v52  ;;  %v141_v19 = vmul.f32 %v1948_v63, %v1783_v7  ;;  %v145_v28 = vmul.f32 %v1949_v20, %v1783_v7  ;;  %v1950_v25 = vcombine.high %v1647_v9, %v1649_v10  ;;  %v234_v60 = vrot.slane %v218_v36, 5  ;;  %v369_v52 = vld [vmem:[#allocation7 + $0x368] sm:$0xff]  ;;  %v372_v20 = vld [vmem:[#allocation7 + $0x380] sm:$0xff] }
  0x5a   :  { %1052 = vmatprep.subr.bf16.mxu0 %v1947_v34  ;;  %v85_v61 = vadd.f32 %v81_v8, %v73_v58  ;;  %v113_v53 = vadd.f32 %v109_v21, %v101_v62  ;;  %v133_v57 = vrot.slane %v129_v24, 3  ;;  %v157_v42 = vmul.f32 %v156_v27, %v1783_v7  ;;  %v364_v21 = vld [vmem:[#allocation7 + $0x340] sm:$0xff] }
  0x5b   :  { %1093 = vmatprep.subr.bf16.mxu1 %v1950_v25  ;;  %v149_v37 = vrot.slane %v145_v28, 1  ;;  %v169_v0 = vmul.f32 %v168_v47, %v1783_v7  ;;  %v181_v6 = vmul.f32 %v180_v40, %v1783_v7  ;;  %v1951_v14 = vcombine.low %v1631_v1, %v1633_v2  ;;  %v376_v28 = vld [vmem:[#allocation7 + $0x3a0] sm:$0xff] }
  0x5c   :  { %v245_v39 = vsel %vm243_vm2, %v242_v54, %v234_v60  ;;  %v1855_v26 = vadd.f32 %v93_v33, %v85_v61  ;;  %v125_v31 = vadd.f32 %v121_v55, %v113_v53  ;;  %v185_v32 = vmul.f32 %v184_v46, %v1783_v7  ;;  %v360_v46 = vld [vmem:[#allocation7 + $0x320] sm:$0xff] }
  0x5d   :  { %1053 = vmatpush1.bf16.msra.mxu0 %v1951_v14  ;;  %v1952_v27 = vcombine.low %v1647_v9, %v1649_v10  ;;  %v1953_v40 = vcombine.high %v1651_v11, %v1661_v15  ;;  %v248_v1 = vsel %vm246_vm3, %v245_v39, %v98_v5  ;;  %v153_v2 = vadd.f32 %v149_v37, %v141_v19  ;;  %v381_v39 = vld [vmem:[#allocation7 + $0x3c8] sm:$0xff] }
  0x5e   :  { %v161_v47 = vrot.slane %v157_v42, 2  ;;  %v173_v29 = vrot.slane %v169_v0, 3  ;;  %v1954_v43 = vcombine.high %v1663_v16, %v1665_v17  ;;  %v251_v62 = vsel %vm249_vm4, %v248_v1, %v222_v48  ;;  %v380_v0 = vld [vmem:[#allocation7 + $0x3c0] sm:$0xff] }
  0x5f   :  { %1094 = vmatpush1.bf16.msra.mxu1 %v1952_v27  ;;  %1054 = vmatprep.subr.bf16.mxu0 %v1953_v40  ;;  %v1871_v9 = vadd.f32 %v133_v57, %v125_v31  ;;  %v189_v10 = vrot.slane %v185_v32, 1  ;;  %v197_v49 = vmul.f32 %v196_v51, %v1783_v7  ;;  %v1328_v5 = vcombine.low %v1751_v35, %v1753_v59  ;;  %v385_v31 = vld [vmem:[#allocation7 + $0x3e8] sm:$0xff] }
  0x60   :  { %1095 = vmatprep.subr.bf16.mxu1 %v1954_v43  ;;  %v254_v8 = vsel %vm252_vm5, %v251_v62, %v228_v13  ;;  %v165_v12 = vadd.f32 %v161_v47, %v153_v2  ;;  %v209_v44 = vmul.f32 %v208_v45, %v1783_v7  ;;  %v1955_v48 = vcombine.low %v1651_v11, %v1661_v15  ;;  %v262_v47 = vld [vmem:[#allocation7 + $0x10] sm:$0xff]  ;;  %v267_v43 = vld [vmem:[#allocation7 + $0x38] sm:$0xff] }
  0x61   :  { %v257_v33 = vsel %vm255_vm6, %v254_v8, %v234_v60  ;;  %v193_v4 = vadd.f32 %v189_v10, %v181_v6  ;;  %v201_v18 = vrot.slane %v197_v49, 2  ;;  %v221_v51 = vrot.slane %v1871_v9, 7  ;;  %v384_v6 = vld [vmem:[#allocation7 + $0x3e0] sm:$0xff]  ;;  %v270_v49 = vld [vmem:[#allocation7 + $0x50] sm:$0xff]  ;;  %v275_v8 = vld [vmem:[#allocation7 + $0x78] sm:$0xff] }
  0x62   :  { %1055 = vmatpush1.bf16.msra.mxu0 %v1955_v48  ;;  %v1956_v36 = vcombine.low %v1663_v16, %v1665_v17  ;;  %v1957_v13 = vcombine.high %v1674_v22, %v1676_v23  ;;  %v1335_v58 = vcombine.high %v356_v56, %v360_v46  ;;  %v1893_v45 = vpack.c.bf16 %v257_v33, %v257_v33  ;;  %v365_v17 = vld [vmem:[#allocation7 + $0x348] sm:$0xff] }
  0x63   :  { %v177_v7 = vadd.f32 %v173_v29, %v165_v12  ;;  %v213_v11 = vrot.slane %v209_v44, 3  ;;  %v1337_v15 = vcombine.high %v357_v50, %v361_v3  ;;  %v205_v24 = vadd.f32 %v201_v18, %v193_v4  ;;  %v373_v22 = vld [vmem:[#allocation7 + $0x388] sm:$0xff]  ;;  %v263_v29 = vld [vmem:[#allocation7 + $0x18] sm:$0xff]  ;;  %v278_v4 = vld [vmem:[#allocation7 + $0x90] sm:$0xff] }
  0x64   :  { %1096 = vmatpush1.bf16.msra.mxu1 %v1956_v36  ;;  %1056 = vmatprep.subr.bf16.mxu0 %v1957_v13  ;;  %v238_v16 = vsel %vm237_vm0, %v1855_v26, %v221_v51  ;;  %v1334_v35 = vcombine.low %v356_v56, %v360_v46  ;;  %v1336_v54 = vcombine.low %v357_v50, %v361_v3  ;;  %v1465_v60 = vmov 0   ;;  %v377_v23 = vld [vmem:[#allocation7 + $0x3a8] sm:$0xff]  ;;  %v271_v3 = vld [vmem:[#allocation7 + $0x58] sm:$0xff]  ;;  %v282_v18 = vld [vmem:[#allocation7 + $0xb0] sm:$0xff] }
  0x65   :  { %1097 = vmatprep.subr.bf16.mxu1 %v1329_v38  ;;  %1066 = vmatprep.mubr.bf16.mxu0 %v1893_v45  ;;  %v227_v34 = vrot.slane %v177_v7, 6  ;;  %v217_v59 = vadd.f32 %v213_v11, %v205_v24  ;;  %v388_v38 = vld [vmem:[%s1938_s3] sm:$0xff]  ;;  %v1343_v55 = vcombine.high %v364_v21, %v368_v30  ;;  %v1345_v19 = vcombine.high %v365_v17, %v369_v52  ;;  %v283_v36 = vld [vmem:[#allocation7 + $0xb8] sm:$0xff]  ;;  %s1466_s3 = smov [#allocation9]  }
  0x66   :  { %1107 = vmatprep.mubr.bf16.mxu1 %v1893_v45  ;;  %1057 = vmatpush1.bf16.msra.mxu0 %v1326_v41  ;;  %v1342_v41 = vcombine.low %v364_v21, %v368_v30  ;;  %v1344_v53 = vcombine.low %v365_v17, %v369_v52  ;;  %v1351_v57 = vcombine.high %v372_v20, %v376_v28  ;;  %v290_v21 = vld [vmem:[#allocation7 + $0xf0] sm:$0xff]  ;;  %v287_v30 = vld [vmem:[#allocation7 + $0xd8] sm:$0xff]  ;;  %s1212_s8 = sshll.u32 %s1466_s3, 4  ;;  %s1213_s8 = int_to_ptr.vmem [resolvable:$true] %s1212_s8 }
  0x67   :  { %1058 = vmatprep.subr.bf16.mxu0 %v1335_v58  ;;  %v241_v63 = vsel %vm240_vm1, %v238_v16, %v227_v34  ;;  %v233_v25 = vrot.slane %v217_v59, 5  ;;  %1373 = vset.pattern.permute.xlu0 %v1465_v60  ;;  %v1353_v42 = vcombine.high %v373_v22, %v377_v23  ;;  %v1350_v32 = vcombine.low %v372_v20, %v376_v28  ;;  %v291_v24 = vld [vmem:[#allocation7 + $0xf8] sm:$0xff]  ;;  %v298_v59 = vld [vmem:[#allocation7 + $0x130] sm:$0xff]  ;;  %s1430_s9 = scalar_lea.vmem %s1213_s8, 1024  ;;  %p1435_p8 = scmp.lt.s32.totalorder %s1213_s8, %s1213_s8 }
  0x68   :  { %1098 = vmatpush1.bf16.msra.mxu1 %v1328_v5  ;;  %391 = vperm.xlu0 %1373, %v388_v38   ;;  %v1352_v27 = vcombine.low %v373_v22, %v377_v23  ;;  %v1359_v40 = vcombine.high %v380_v0, %v384_v6  ;;  %v1361_v2 = vcombine.high %v381_v39, %v385_v31  ;;  %v274_v5 = vld [vmem:[#allocation7 + $0x70] sm:$0xff]  ;;  %v295_v38 = vld [vmem:[#allocation7 + $0x118] sm:$0xff]  ;;  %p1431_p7 = scmp.ne.s32.totalorder %s1213_s8, %s1430_s9  ;;  %p1436_p9 = scmp.lt.s32.totalorder %s1430_s9, %s1430_s9 }
  0x69   :  { %1099 = vmatprep.subr.bf16.mxu1 %v1337_v15  ;;  %v244_v61 = vsel %vm243_vm2, %v241_v63, %v233_v25  ;;  %v1358_v56 = vcombine.low %v380_v0, %v384_v6  ;;  %v1360_v62 = vcombine.low %v381_v39, %v385_v31  ;;  %v1245_v10 = vcombine.high %v263_v29, %v267_v43  ;;  %v286_v15 = vld [vmem:[#allocation7 + $0xd0] sm:$0xff]  ;;  %v307_v60 = vld [vmem:[#allocation7 + $0x178] sm:$0xff] }
  0x6a   :  { %1059 = vmatpush1.bf16.msra.mxu0 %v1334_v35  ;;  %v247_v37 = vsel %vm246_vm3, %v244_v61, %v1855_v26  ;;  %v266_v26 = vld [vmem:[#allocation7 + $0x30] sm:$0xff]  ;;  %v1244_v44 = vcombine.low %v263_v29, %v267_v43  ;;  %v1251_v48 = vcombine.high %v270_v49, %v274_v5  ;;  %v1253_v33 = vcombine.high %v271_v3, %v275_v8  ;;  %p1437_p10 = por %p1436_p9, %p1435_p8 }
  0x6b   :  { %1060 = vmatprep.subr.bf16.mxu0 %v1343_v55  ;;  %v250_v14 = vsel %vm249_vm4, %v247_v37, %v221_v51  ;;  %v1243_v9 = vcombine.high %v262_v47, %v266_v26  ;;  %v1242_v12 = vcombine.low %v262_v47, %v266_v26  ;;  %v279_v51 = vld [vmem:[#allocation7 + $0x98] sm:$0xff]  ;;  %v1250_v13 = vcombine.low %v270_v49, %v274_v5  ;;  %v294_v35 = vld [vmem:[#allocation7 + $0x110] sm:$0xff] }
  0x6c   :  { %1100 = vmatpush1.bf16.msra.mxu1 %v1336_v54  ;;  %v253_v1 = vsel %vm252_vm5, %v250_v14, %v227_v34  ;;  %v1252_v58 = vcombine.low %v271_v3, %v275_v8  ;;  %v1259_v7 = vcombine.high %v278_v4, %v282_v18  ;;  %v1261_v11 = vcombine.high %v279_v51, %v283_v36  ;;  %v299_v54 = vld [vmem:[#allocation7 + $0x138] sm:$0xff]  ;;  %v302_v20 = vld [vmem:[#allocation7 + $0x150] sm:$0xff]  ;;  %p1438_p11 = pnand %p1437_p10, %p1431_p7 }
  0x6d   :  { %1101 = vmatprep.subr.bf16.mxu1 %v1345_v19  ;;  %v256_v46 = vsel %vm255_vm6, %v253_v1, %v233_v25  ;;  %v1258_v16 = vcombine.low %v278_v4, %v282_v18  ;;  %v1260_v17 = vcombine.low %v279_v51, %v283_v36  ;;  %v1267_v52 = vcombine.high %v286_v15, %v290_v21  ;;  %v306_v28 = vld [vmem:[#allocation7 + $0x170] sm:$0xff]  ;;  %v303_v25 = vld [vmem:[#allocation7 + $0x158] sm:$0xff] }
  0x6e   :  { %1061 = vmatpush1.bf16.msra.mxu0 %v1342_v41  ;;  %v1915_v50 = vpack.c.bf16 %v256_v46, %v256_v46  ;;  %v1269_v34 = vcombine.high %v287_v30, %v291_v24  ;;  %v1266_v55 = vcombine.low %v286_v15, %v290_v21  ;;  %v1268_v63 = vcombine.low %v287_v30, %v291_v24  ;;  %v311_v37 = vld [vmem:[#allocation7 + $0x198] sm:$0xff]  ;;  %v318_v31 = vld [vmem:[#allocation7 + $0x1d0] sm:$0xff] }
  0x6f   :  { %1062 = vmatprep.subr.bf16.mxu0 %v1351_v57  ;;  %v1275_v19 = vcombine.high %v294_v35, %v298_v59  ;;  %v1274_v22 = vcombine.low %v294_v35, %v298_v59  ;;  %v1276_v23 = vcombine.low %v295_v38, %v299_v54  ;;  %v1283_v41 = vcombine.high %v302_v20, %v306_v28  ;;  %v314_v57 = vld [vmem:[#allocation7 + $0x1b0] sm:$0xff]  ;;  %v331_v46 = vld [vmem:[#allocation7 + $0x238] sm:$0xff] }
  0x70   :  { %1102 = vmatpush1.bf16.msra.mxu1 %v1344_v53  ;;  %v1285_v61 = vcombine.high %v303_v25, %v307_v60  ;;  %v310_v53 = vld [vmem:[#allocation7 + $0x190] sm:$0xff]  ;;  %v1282_v0 = vcombine.low %v302_v20, %v306_v28  ;;  %v1284_v6 = vcombine.low %v303_v25, %v307_v60  ;;  %v335_v8 = vld [vmem:[#allocation7 + $0x258] sm:$0xff] }
  0x71   :  { %1103 = vmatprep.subr.bf16.mxu1 %v1353_v42  ;;  %v315_v42 = vld [vmem:[#allocation7 + $0x1b8] sm:$0xff]  ;;  %v1291_v14 = vcombine.high %v310_v53, %v314_v57  ;;  %v1290_v1 = vcombine.low %v310_v53, %v314_v57  ;;  %v326_v29 = vld [vmem:[#allocation7 + $0x210] sm:$0xff] }
  0x72   :  { %1063 = vmatpush1.bf16.msra.mxu0 %v1350_v32  ;;  %v1293_v39 = vcombine.high %v311_v37, %v315_v42  ;;  %v322_v32 = vld [vmem:[#allocation7 + $0x1f0] sm:$0xff]  ;;  %v343_v36 = vld [vmem:[#allocation7 + $0x298] sm:$0xff] }
  0x73   :  { %1064 = vmatprep.subr.bf16.mxu0 %v1359_v40  ;;  %v323_v40 = vld [vmem:[#allocation7 + $0x1f8] sm:$0xff]  ;;  %v1299_v47 = vcombine.high %v318_v31, %v322_v32  ;;  %v330_v43 = vld [vmem:[#allocation7 + $0x230] sm:$0xff] }
  0x74   :  { %1104 = vmatpush1.bf16.msra.mxu1 %v1352_v27  ;;  %v319_v27 = vld [vmem:[#allocation7 + $0x1d8] sm:$0xff]  ;;  %v334_v5 = vld [vmem:[#allocation7 + $0x250] sm:$0xff] }
  0x75   :  { %1105 = vmatprep.subr.bf16.mxu1 %v1361_v2  ;;  %v1292_v2 = vcombine.low %v311_v37, %v315_v42  ;;  %v1301_v26 = vcombine.high %v319_v27, %v323_v40  ;;  %v338_v3 = vld [vmem:[#allocation7 + $0x270] sm:$0xff]  ;;  %v351_v24 = vld [vmem:[#allocation7 + $0x2d8] sm:$0xff] }
  0x76   :  { %1065 = vmatpush1.bf16.msra.mxu0 %v1358_v56  ;;  %v327_v56 = vld [vmem:[#allocation7 + $0x218] sm:$0xff]  ;;  %v342_v18 = vld [vmem:[#allocation7 + $0x290] sm:$0xff] }
  0x77   :  { %1116 = vmatprep.subr.bf16.mxu0 %v1243_v9  ;;  %v1300_v9 = vcombine.low %v319_v27, %v323_v40  ;;  %v1309_v49 = vcombine.high %v327_v56, %v331_v46  ;;  %v346_v51 = vld [vmem:[#allocation7 + $0x2b0] sm:$0xff]  ;;  %v367_v60 = vld [vmem:[#allocation7 + $0x358] sm:$0xff] }
  0x78   :  { %1106 = vmatpush1.bf16.msra.mxu1 %v1360_v62  ;;  %v1298_v62 = vcombine.low %v318_v31, %v322_v32  ;;  %v350_v21 = vld [vmem:[#allocation7 + $0x2d0] sm:$0xff]  ;;  %v375_v42 = vld [vmem:[#allocation7 + $0x398] sm:$0xff] }
  0x79   :  { %1157 = vmatprep.subr.bf16.mxu1 %v1245_v10  ;;  %1067 = vmatmul.mubr.bf16.vlgmr.msra.gmra.mrb[0].mxu0 %v1915_v50  ;;  %v1307_v10 = vcombine.high %v326_v29, %v330_v43  ;;  %v354_v30 = vld [vmem:[#allocation7 + $0x2f0] sm:$0xff]  ;;  %v383_v40 = vld [vmem:[#allocation7 + $0x3d8] sm:$0xff] }
  0x7a   :  { %1117 = vmatpush1.bf16.msra.mxu0 %v1242_v12  ;;  %1148 = vmatprep.mubr.bf16.mxu0 %v1893_v45  ;;  %v339_v12 = vld [vmem:[#allocation7 + $0x278] sm:$0xff]  ;;  %v358_v59 = vld [vmem:[#allocation7 + $0x310] sm:$0xff] }
  0x7b   :  { %1108 = vmatmul.mubr.bf16.vlgmr.msra.gmra.mrb[0].mxu1 %v1915_v50  ;;  %1118 = vmatprep.subr.bf16.mxu0 %v1251_v48  ;;  %v1308_v48 = vcombine.low %v327_v56, %v331_v46  ;;  %v1317_v4 = vcombine.high %v335_v8, %v339_v12  ;;  %v366_v28 = vld [vmem:[#allocation7 + $0x350] sm:$0xff] }
  0x7c   :  { %1158 = vmatpush1.bf16.msra.mxu1 %v1244_v44  ;;  %1189 = vmatprep.mubr.bf16.mxu1 %v1893_v45  ;;  %v1277_v45 = vcombine.high %v295_v38, %v299_v54  ;;  %v1306_v44 = vcombine.low %v326_v29, %v330_v43  ;;  %v362_v38 = vld [vmem:[#allocation7 + $0x330] sm:$0xff]  ;;  %v359_v54 = vld [vmem:[#allocation7 + $0x318] sm:$0xff] }
  0x7d   :  { %1159 = vmatprep.subr.bf16.mxu1 %v1253_v33  ;;  %v1315_v33 = vcombine.high %v334_v5, %v338_v3  ;;  %v370_v25 = vld [vmem:[#allocation7 + $0x370] sm:$0xff] }
  0x7e   :  { %1119 = vmatpush1.bf16.msra.mxu0 %v1250_v13  ;;  %v347_v13 = vld [vmem:[#allocation7 + $0x2b8] sm:$0xff]  ;;  %v374_v57 = vld [vmem:[#allocation7 + $0x390] sm:$0xff] }
  0x7f   :  { %1120 = vmatprep.subr.bf16.mxu0 %v1259_v7  ;;  %v1316_v7 = vcombine.low %v335_v8, %v339_v12  ;;  %v1325_v15 = vcombine.high %v343_v36, %v347_v13  ;;  %v378_v37 = vld [vmem:[#allocation7 + $0x3b0] sm:$0xff] }
  0x80   :  { %1160 = vmatpush1.bf16.msra.mxu1 %v1252_v58  ;;  %v1314_v58 = vcombine.low %v334_v5, %v338_v3  ;;  %v382_v32 = vld [vmem:[#allocation7 + $0x3d0] sm:$0xff] }
  0x81   :  { %1161 = vmatprep.subr.bf16.mxu1 %v1261_v11  ;;  %v1323_v11 = vcombine.high %v342_v18, %v346_v51  ;;  %v386_v27 = vld [vmem:[#allocation7 + $0x3f0] sm:$0xff] }
  0x82   :  { %1121 = vmatpush1.bf16.msra.mxu0 %v1258_v16  ;;  %v355_v16 = vld [vmem:[#allocation7 + $0x2f8] sm:$0xff]  ;;  %v1362_v43 = vcombine.low %v382_v32, %v386_v27 }
  0x83   :  { %1122 = vmatprep.subr.bf16.mxu0 %v1267_v52  ;;  %v1324_v52 = vcombine.low %v343_v36, %v347_v13  ;;  %v1333_v35 = vcombine.high %v351_v24, %v355_v16 }
  0x84   :  { %1162 = vmatpush1.bf16.msra.mxu1 %v1260_v17  ;;  %v1322_v17 = vcombine.low %v342_v18, %v346_v51 }
  0x85   :  { %1163 = vmatprep.subr.bf16.mxu1 %v1269_v34  ;;  %v1331_v34 = vcombine.high %v350_v21, %v354_v30 }
  0x86   :  { %1123 = vmatpush1.bf16.msra.mxu0 %v1266_v55  ;;  %v363_v55 = vld [vmem:[#allocation7 + $0x338] sm:$0xff] }
  0x87   :  { %1124 = vmatprep.subr.bf16.mxu0 %v1275_v19  ;;  %v1332_v19 = vcombine.low %v351_v24, %v355_v16  ;;  %v1341_v20 = vcombine.high %v359_v54, %v363_v55 }
  0x88   :  { %1164 = vmatpush1.bf16.msra.mxu1 %v1268_v63  ;;  %v1330_v63 = vcombine.low %v350_v21, %v354_v30 }
  0x89   :  { %1165 = vmatprep.subr.bf16.mxu1 %v1277_v45  ;;  %v1339_v45 = vcombine.high %v358_v59, %v362_v38 }
  0x8a   :  { %1125 = vmatpush1.bf16.msra.mxu0 %v1274_v22  ;;  %v371_v22 = vld [vmem:[#allocation7 + $0x378] sm:$0xff] }
  0x8b   :  { %1126 = vmatprep.subr.bf16.mxu0 %v1283_v41  ;;  %v1340_v41 = vcombine.low %v359_v54, %v363_v55  ;;  %v1349_v53 = vcombine.high %v367_v60, %v371_v22 }
  0x8c   :  { %1166 = vmatpush1.bf16.msra.mxu1 %v1276_v23  ;;  %v1338_v23 = vcombine.low %v358_v59, %v362_v38 }
  0x8d   :  { %1167 = vmatprep.subr.bf16.mxu1 %v1285_v61  ;;  %v1347_v61 = vcombine.high %v366_v28, %v370_v25 }
  0x8e   :  { %1127 = vmatpush1.bf16.msra.mxu0 %v1282_v0  ;;  %v379_v0 = vld [vmem:[#allocation7 + $0x3b8] sm:$0xff] }
  0x8f   :  { %1128 = vmatprep.subr.bf16.mxu0 %v1291_v14  ;;  %v1348_v14 = vcombine.low %v367_v60, %v371_v22  ;;  %v1357_v31 = vcombine.high %v375_v42, %v379_v0 }
  0x90   :  { %1168 = vmatpush1.bf16.msra.mxu1 %v1284_v6  ;;  %v1346_v6 = vcombine.low %v366_v28, %v370_v25 }
  0x91   :  { %1169 = vmatprep.subr.bf16.mxu1 %v1293_v39  ;;  %v1355_v39 = vcombine.high %v374_v57, %v378_v37 }
  0x92   :  { %1129 = vmatpush1.bf16.msra.mxu0 %v1290_v1  ;;  %v387_v1 = vld [vmem:[#allocation7 + $0x3f8] sm:$0xff] }
  0x93   :  { %1130 = vmatprep.subr.bf16.mxu0 %v1299_v47  ;;  %v1356_v47 = vcombine.low %v375_v42, %v379_v0  ;;  %v1365_v29 = vcombine.high %v383_v40, %v387_v1  ;;  %v1364_v56 = vcombine.low %v383_v40, %v387_v1 }
  0x94   :  { %1170 = vmatpush1.bf16.msra.mxu1 %v1292_v2  ;;  %v1354_v2 = vcombine.low %v374_v57, %v378_v37 }
  0x95   :  { %1171 = vmatprep.subr.bf16.mxu1 %v1301_v26  ;;  %v1363_v26 = vcombine.high %v382_v32, %v386_v27 }
  0x96   :  { %1131 = vmatpush1.bf16.msra.mxu0 %v1298_v62 }
  0x97   :  { %1132 = vmatprep.subr.bf16.mxu0 %v1307_v10 }
  0x98   :  { %1172 = vmatpush1.bf16.msra.mxu1 %v1300_v9 }
  0x99   :  { %1173 = vmatprep.subr.bf16.mxu1 %v1309_v49 }
  0x9a   :  { %1133 = vmatpush1.bf16.msra.mxu0 %v1306_v44 }
  0x9b   :  { %1134 = vmatprep.subr.bf16.mxu0 %v1315_v33 }
  0x9c   :  { %1174 = vmatpush1.bf16.msra.mxu1 %v1308_v48 }
  0x9d   :  { %1175 = vmatprep.subr.bf16.mxu1 %v1317_v4 }
  0x9e   :  { %1135 = vmatpush1.bf16.msra.mxu0 %v1314_v58 }
  0x9f   :  { %1136 = vmatprep.subr.bf16.mxu0 %v1323_v11 }
  0xa0   :  { %1176 = vmatpush1.bf16.msra.mxu1 %v1316_v7 }
  0xa1   :  { %1177 = vmatprep.subr.bf16.mxu1 %v1325_v15 }
  0xa2   :  { %1137 = vmatpush1.bf16.msra.mxu0 %v1322_v17 }
  0xa3   :  { %1138 = vmatprep.subr.bf16.mxu0 %v1331_v34 }
  0xa4   :  { %1178 = vmatpush1.bf16.msra.mxu1 %v1324_v52 }
  0xa5   :  { %1179 = vmatprep.subr.bf16.mxu1 %v1333_v35 }
  0xa6   :  { %1139 = vmatpush1.bf16.msra.mxu0 %v1330_v63 }
  0xa7   :  { %1140 = vmatprep.subr.bf16.mxu0 %v1339_v45 }
  0xa8   :  { %1180 = vmatpush1.bf16.msra.mxu1 %v1332_v19 }
  0xa9   :  { %1181 = vmatprep.subr.bf16.mxu1 %v1341_v20 }
  0xaa   :  { %1141 = vmatpush1.bf16.msra.mxu0 %v1338_v23 }
  0xab   :  { %1142 = vmatprep.subr.bf16.mxu0 %v1347_v61 }
  0xac   :  { %1182 = vmatpush1.bf16.msra.mxu1 %v1340_v41 }
  0xad   :  { %1183 = vmatprep.subr.bf16.mxu1 %v1349_v53 }
  0xae   :  { %1143 = vmatpush1.bf16.msra.mxu0 %v1346_v6 }
  0xaf   :  { %1144 = vmatprep.subr.bf16.mxu0 %v1355_v39 }
  0xb0   :  { %1184 = vmatpush1.bf16.msra.mxu1 %v1348_v14 }
  0xb1   :  { %1185 = vmatprep.subr.bf16.mxu1 %v1357_v31 }
  0xb2   :  { %1145 = vmatpush1.bf16.msra.mxu0 %v1354_v2 }
  0xb3   :  { %1146 = vmatprep.subr.bf16.mxu0 %v1363_v26 }
  0xb4   :  { %1186 = vmatpush1.bf16.msra.mxu1 %v1356_v47 }
  0xb5   :  { %1187 = vmatprep.subr.bf16.mxu1 %v1365_v29 }
  0xb6   :  { %1147 = vmatpush1.bf16.msra.mxu0 %v1362_v43 }
  0xb8   :  { %1188 = vmatpush1.bf16.msra.mxu1 %v1364_v56 }
  0xb9   :  { %1149 = vmatmul.mubr.bf16.vlgmr.msra.gmra.mrb[4].mxu0 %v1915_v50 }
  0xbb   :  { %1190 = vmatmul.mubr.bf16.vlgmr.msra.gmra.mrb[4].mxu1 %v1915_v50 }
  0xe7   :  { %v392_v46 = vpop.permute.xlu0 %391 }
 0x14c   :  { %v1068_v62 = vpop.f32.mrb[0].mxu0 }
 0x14d   :  { %v1069_v10 = vadd.f32 %v1068_v62, %v392_v46  ;;  %v1070_v49 = vpop.f32.mrb[1].mxu0 }
 0x14e   :  { %v1109_v9 = vpop.f32.mrb[0].mxu1  ;;  %v1071_v3 = vadd.f32 %v1070_v49, %v392_v46  ;;  %v1072_v12 = vpop.f32.mrb[2].mxu0 }
 0x14f   :  { %v1110_v5 = vadd.f32 %v1109_v9, %v392_v46  ;;  %v1111_v8 = vpop.f32.mrb[1].mxu1  ;;  %1198 = vst [vmem:[#allocation9] sm:$0xff] %v1069_v10  ;;  %v1073_v33 = vpop.f32.mrb[3].mxu0 }
 0x150   :  { %v1112_v44 = vadd.f32 %v1111_v8, %v392_v46  ;;  %v1113_v48 = vpop.f32.mrb[2].mxu1  ;;  %1199 = vst [vmem:[#allocation9 + $0x8] sm:$0xff] %v1071_v3 }
 0x151   :  { %1200 = vst [vmem:[#allocation9 + $0x10] sm:$0xff] %v1110_v5  ;;  %v1114_v4 = vpop.f32.mrb[3].mxu1 }
 0x152   :  { %1201 = vst [vmem:[#allocation9 + $0x18] sm:$0xff] %v1112_v44 }
 0x18c   :  { %v1150_v18 = vpop.f32.mrb[4].mxu0 }
 0x18d   :  { %v1151_v50 = vadd.f32 %v1150_v18, %v392_v46  ;;  %v1152_v36 = vpop.f32.mrb[5].mxu0 }
 0x18e   :  { %v1191_v51 = vpop.f32.mrb[4].mxu1  ;;  %v1153_v58 = vadd.f32 %v1152_v36, %v392_v46  ;;  %v1154_v11 = vpop.f32.mrb[6].mxu0 }
 0x18f   :  { %v1192_v13 = vadd.f32 %v1191_v51, %v392_v46  ;;  %v1193_v7 = vpop.f32.mrb[5].mxu1  ;;  %1202 = vst [vmem:[#allocation9 + $0x20] sm:$0xff] %v1151_v50  ;;  %v1155_v30 = vpop.f32.mrb[7].mxu0 }
 0x190   :  { %v1194_v15 = vadd.f32 %v1193_v7, %v392_v46  ;;  %v1195_v21 = vpop.f32.mrb[6].mxu1  ;;  %1203 = vst [vmem:[#allocation9 + $0x28] sm:$0xff] %v1153_v58 }
 0x191   :  { %1204 = vst [vmem:[#allocation9 + $0x30] sm:$0xff] %v1192_v13  ;;  %v1196_v24 = vpop.f32.mrb[7].mxu1 }
 0x192   :  { %1205 = vst [vmem:[#allocation9 + $0x38] sm:$0xff] %v1194_v15 }
 0x193   :  { %1441 = shalt.err (!%p1438_p11)
}
 0x194   :  { %s1442_s0 = scalar_lea.hbm %s1939_s4, 1024 }
 0x195   :  { %p1443_p12 = scmp.ne.s32.totalorder %s1939_s4, %s1442_s0  ;;  %p1446_p13 = scmp.lt.u32.totalorder %s1442_s0, %s1939_s4 }
 0x197   :  { %p1448_p0 = pnand %p1446_p13, %p1443_p12 }
 0x199   :  { %1451 = shalt.err (!%p1448_p0)
}
 0x19a   :  { %1215 = dma.vmem_to_hbm [thread:$0]  %s1213_s8, 1024, %s1939_s4, [#allocation4]  }
 0x19b   :  { %1458 = dma.done.wait [#allocation4], 1024  }
 0x19c   :  { %1459 = vsyncadd [#allocation4], 4294966272 }
 0x19d   :  { %1219 = vsyncpa [#allocation3], 1 }
 0x19e   :  { %1220 = vsyncpa [#allocation8], 1 }
 0x19f   :  { %1221 = vsyncpa [#allocation4], 1 }
 0x1a0   :  { %1222 = vsyncpa [#allocation5], 1 }

</bundles_post_ra>
